<compile_context>
chip_gen: v6e
topology: v6e:2x2x1
jax: 0.10.0
libtpu: 0.0.40
codegen_flags: <defaults>
</compile_context>

<pallas_src>
import jax
import jax.numpy as jnp
from jax.experimental import pallas as pl
from jax.experimental.pallas import tpu as pltpu


# ----------------------- configuration (small, synthetic) -----------------------
BATCH = 2
SEQ = 8
HIDDEN = 32
NUM_HEADS = 4
HEAD_DIM = HIDDEN // NUM_HEADS  # 8
ATTN_DROPOUT_PROB = 0.1  # TODO(synk): dropout is identity here (eval-mode semantics)


def mha_kernel(x_ref, w_ref, b_ref, o_ref):
    """Whole-problem multi-head attention in one invocation.

    x_ref : (B*S, H)   flattened hidden states
    w_ref : (H, 3H)    fused [Wq*scale | Wk | Wv]
    b_ref : (1, 3H)    fused [bq*scale | bk | bv]
    o_ref : (B*S, H)   output context layer (flattened)
    """
    x = x_ref[...]                                               # (B*S, H) f32

    # Single fused projection: one MXU pass with N = 3H (instead of 3 passes
    # with N = H), one bias add.
    qkv = jnp.dot(x, w_ref[...], preferred_element_type=jnp.float32) + b_ref[...]

    # Layout plumbing: gather per-(batch, head) blocks into one
    # (B*NUM_HEADS, S, HEAD_DIM) batch so attention runs as head-batched
    # contractions.  One lane-slice per head; per-batch split is a tile-aligned
    # sublane slice (rows 0:8 / 8:16), i.e. near-free vreg selection.
    def to_heads(col_base):
        cols = [qkv[:, col_base + h * HEAD_DIM: col_base + (h + 1) * HEAD_DIM]
                for h in range(NUM_HEADS)]                       # NH x (B*S, dh)
        blocks = [cols[h][b * SEQ:(b + 1) * SEQ, :]              # (S, dh)
                  for b in range(BATCH) for h in range(NUM_HEADS)]
        return jnp.stack(blocks, axis=0)                         # (B*NH, S, dh)

    q = to_heads(0)
    k = to_heads(HIDDEN)
    v = to_heads(2 * HIDDEN)

    # attention_scores = (Q / sqrt(dh)) @ K^T -- the scale is already folded
    # into Wq/bq, and the contraction is on the last dims so no explicit
    # transpose of K is materialized.
    scores = jnp.einsum("hqd,hkd->hqk", q, k,
                        preferred_element_type=jnp.float32)      # (B*NH, S, S)

    # TODO(synk): additive attention_mask not supported; add `scores += mask`
    #             here if padded / causal sequences are needed.

    # Numerically stable softmax along the key axis (all f32).
    m = jnp.max(scores, axis=-1, keepdims=True)
    e = jnp.exp(scores - m)
    denom = jnp.sum(e, axis=-1, keepdims=True)
    probs = e * pl.reciprocal(denom, approx=False)               # exact: 1e-4 bound

    # TODO(synk): attention-prob dropout skipped (eval mode).

    ctx = jnp.einsum("hqk,hkd->hqd", probs, v,
                     preferred_element_type=jnp.float32)         # (B*NH, S, dh)

    # Pack heads back into (B*S, H) and do ONE dense store of the whole block.
    rows_out = [jnp.concatenate(
        [ctx[b * NUM_HEADS + h] for h in range(NUM_HEADS)], axis=-1)   # (S, H)
        for b in range(BATCH)]
    out = jnp.concatenate(rows_out, axis=0)                      # (B*S, H)
    o_ref[...] = out.astype(o_ref.dtype)


def multi_head_attention(hidden_states, wq, wk, wv, bq, bk, bv):
    """hidden_states: (B, S, H) float32 -> (B, S, H) float32."""
    B, S, H = hidden_states.shape
    scale = 1.0 / jnp.sqrt(jnp.float32(HEAD_DIM))

    # Parameter prep (outside the kernel, once): fold the 1/sqrt(dh) scale into
    # the query projection and fuse Q/K/V weights & biases.
    w_qkv = jnp.concatenate([wq * scale, wk, wv], axis=1)              # (H, 3H)
    b_qkv = jnp.concatenate([bq * scale, bk, bv]).reshape(1, 3 * H)    # (1, 3H)

    x_flat = hidden_states.reshape(B * S, H)

    # TODO(synk): at real BERT sizes, pad H to a multiple of 128 lanes, tile the
    #             B*S axis on a "parallel" grid dim (block sizes budgeted
    #             against 64 MiB VMEM on v7x), and keep the fused-QKV matmul
    #             per tile.
    grid_spec = pltpu.PrefetchScalarGridSpec(
        num_scalar_prefetch=0,
        grid=(1,),  # whole tiny problem in one step: no per-step grid overhead
        in_specs=[
            pl.BlockSpec((B * S, H), lambda i: (0, 0)),     # x (flattened)
            pl.BlockSpec((H, 3 * H), lambda i: (0, 0)),     # fused W_qkv
            pl.BlockSpec((1, 3 * H), lambda i: (0, 0)),     # fused b_qkv
        ],
        out_specs=pl.BlockSpec((B * S, H), lambda i: (0, 0)),
    )

    out_flat = pl.pallas_call(
        mha_kernel,
        out_shape=jax.ShapeDtypeStruct((B * S, H), hidden_states.dtype),
        grid_spec=grid_spec,
        compiler_params=pltpu.CompilerParams(
            dimension_semantics=("arbitrary",),
        ),
    )(x_flat, w_qkv, b_qkv)

    return out_flat.reshape(B, S, H)


def mha_reference(x, wq, wk, wv, bq, bk, bv):
    """Pure-JAX reference mirroring the PyTorch module (eval mode, no mask)."""
    B, S, H = x.shape
    q = x @ wq + bq
    k = x @ wk + bk
    v = x @ wv + bv

    def split(t):  # (B,S,H) -> (B, nh, S, dh)
        return t.reshape(B, S, NUM_HEADS, HEAD_DIM).transpose(0, 2, 1, 3)

    qh, kh, vh = split(q), split(k), split(v)
    scores = jnp.einsum("bhqd,bhkd->bhqk", qh, kh) / jnp.sqrt(jnp.float32(HEAD_DIM))
    probs = jax.nn.softmax(scores, axis=-1)
    ctx = jnp.einsum("bhqk,bhkd->bhqd", probs, vh)
    return ctx.transpose(0, 2, 1, 3).reshape(B, S, H)


if __name__ == "__main__":
    key = jax.random.PRNGKey(0)
    kx, kwq, kwk, kwv, kbq, kbk, kbv = jax.random.split(key, 7)

    hidden_states = jax.random.normal(kx, (BATCH, SEQ, HIDDEN), dtype=jnp.float32)

    # Deterministic parameter init (shapes follow nn.Linear(H, H) for Q/K/V,
    # stored as W such that y = x @ W + b, i.e. W = linear.weight.T).
    init_scale = 1.0 / jnp.sqrt(jnp.float32(HIDDEN))
    wq = jax.random.uniform(kwq, (HIDDEN, HIDDEN), jnp.float32, -init_scale, init_scale)
    wk = jax.random.uniform(kwk, (HIDDEN, HIDDEN), jnp.float32, -init_scale, init_scale)
    wv = jax.random.uniform(kwv, (HIDDEN, HIDDEN), jnp.float32, -init_scale, init_scale)
    bq = jax.random.uniform(kbq, (HIDDEN,), jnp.float32, -init_scale, init_scale)
    bk = jax.random.uniform(kbk, (HIDDEN,), jnp.float32, -init_scale, init_scale)
    bv = jax.random.uniform(kbv, (HIDDEN,), jnp.float32, -init_scale, init_scale)

    out = multi_head_attention(hidden_states, wq, wk, wv, bq, bk, bv)
    out = jax.block_until_ready(out)

    ref = mha_reference(hidden_states, wq, wk, wv, bq, bk, bv)
    assert out.shape == (BATCH, SEQ, HIDDEN)
    assert jnp.allclose(out, ref, atol=1e-4, rtol=1e-4), "mismatch vs reference"

    print("KERNEL_OK")
</pallas_src>

<mosaic_0001>
module attributes {stable_mosaic.version = 11 : i64} {
  func.func @mha_kernel(%arg0: i32, %arg1: memref<16x32xf32, #tpu.memory_space<vmem>>, %arg2: memref<32x96xf32, #tpu.memory_space<vmem>>, %arg3: memref<1x96xf32, #tpu.memory_space<vmem>>, %arg4: memref<16x32xf32, #tpu.memory_space<vmem>>) attributes {dimension_semantics = [#tpu.dimension_semantics<arbitrary>], iteration_bounds = array<i64: 1>, scalar_prefetch = 0 : i64, scratch_operands = 0 : i64, tpu.core_type = #tpu.core_type<tc>, window_params = [{pipeline_mode = #tpu.pipeline_mode<synchronous>, transform_indices = @transform_0, window_bounds = array<i64: 16, 32>}, {pipeline_mode = #tpu.pipeline_mode<synchronous>, transform_indices = @transform_1, window_bounds = array<i64: 32, 96>}, {pipeline_mode = #tpu.pipeline_mode<synchronous>, transform_indices = @transform_2, window_bounds = array<i64: 1, 96>}, {pipeline_mode = #tpu.pipeline_mode<synchronous>, transform_indices = @transform_3, window_bounds = array<i64: 16, 32>}]} {
    %c0 = arith.constant 0 : index
    %c0_0 = arith.constant 0 : index
    %0 = vector.load %arg1[%c0, %c0_0] : memref<16x32xf32, #tpu.memory_space<vmem>>, vector<16x32xf32>
    %c0_1 = arith.constant 0 : index
    %c0_2 = arith.constant 0 : index
    %1 = vector.load %arg2[%c0_1, %c0_2] : memref<32x96xf32, #tpu.memory_space<vmem>>, vector<32x96xf32>
    %cst = arith.constant dense<0.000000e+00> : vector<16x96xf32>
    %2 = tpu.matmul %0, %1, %cst {dimension_numbers = #tpu.dot_dimension_numbers<[1], [0], [0], [1], [0, 0, 1, 1], [], []>} : vector<16x32xf32>, vector<32x96xf32>, vector<16x96xf32> -> vector<16x96xf32>
    %c0_3 = arith.constant 0 : index
    %c0_4 = arith.constant 0 : index
    %3 = vector.load %arg3[%c0_3, %c0_4] : memref<1x96xf32, #tpu.memory_space<vmem>>, vector<1x96xf32>
    %4 = vector.broadcast %3 : vector<1x96xf32> to vector<16x96xf32>
    %5 = arith.addf %2, %4 : vector<16x96xf32>
    %6 = vector.extract_strided_slice %5 {offsets = [0, 0], sizes = [16, 8], strides = [1, 1]} : vector<16x96xf32> to vector<16x8xf32>
    %7 = vector.extract_strided_slice %5 {offsets = [0, 8], sizes = [16, 8], strides = [1, 1]} : vector<16x96xf32> to vector<16x8xf32>
    %8 = vector.extract_strided_slice %5 {offsets = [0, 16], sizes = [16, 8], strides = [1, 1]} : vector<16x96xf32> to vector<16x8xf32>
    %9 = vector.extract_strided_slice %5 {offsets = [0, 24], sizes = [16, 8], strides = [1, 1]} : vector<16x96xf32> to vector<16x8xf32>
    %10 = vector.extract_strided_slice %6 {offsets = [0, 0], sizes = [8, 8], strides = [1, 1]} : vector<16x8xf32> to vector<8x8xf32>
    %11 = vector.extract_strided_slice %7 {offsets = [0, 0], sizes = [8, 8], strides = [1, 1]} : vector<16x8xf32> to vector<8x8xf32>
    %12 = vector.extract_strided_slice %8 {offsets = [0, 0], sizes = [8, 8], strides = [1, 1]} : vector<16x8xf32> to vector<8x8xf32>
    %13 = vector.extract_strided_slice %9 {offsets = [0, 0], sizes = [8, 8], strides = [1, 1]} : vector<16x8xf32> to vector<8x8xf32>
    %14 = vector.extract_strided_slice %6 {offsets = [8, 0], sizes = [8, 8], strides = [1, 1]} : vector<16x8xf32> to vector<8x8xf32>
    %15 = vector.extract_strided_slice %7 {offsets = [8, 0], sizes = [8, 8], strides = [1, 1]} : vector<16x8xf32> to vector<8x8xf32>
    %16 = vector.extract_strided_slice %8 {offsets = [8, 0], sizes = [8, 8], strides = [1, 1]} : vector<16x8xf32> to vector<8x8xf32>
    %17 = vector.extract_strided_slice %9 {offsets = [8, 0], sizes = [8, 8], strides = [1, 1]} : vector<16x8xf32> to vector<8x8xf32>
    %18 = vector.shape_cast %10 : vector<8x8xf32> to vector<1x8x8xf32>
    %19 = vector.shape_cast %11 : vector<8x8xf32> to vector<1x8x8xf32>
    %20 = vector.shape_cast %12 : vector<8x8xf32> to vector<1x8x8xf32>
    %21 = vector.shape_cast %13 : vector<8x8xf32> to vector<1x8x8xf32>
    %22 = vector.shape_cast %14 : vector<8x8xf32> to vector<1x8x8xf32>
    %23 = vector.shape_cast %15 : vector<8x8xf32> to vector<1x8x8xf32>
    %24 = vector.shape_cast %16 : vector<8x8xf32> to vector<1x8x8xf32>
    %25 = vector.shape_cast %17 : vector<8x8xf32> to vector<1x8x8xf32>
    %26 = tpu.concatenate %18, %19, %20, %21, %22, %23, %24, %25 in 0 : vector<1x8x8xf32>, vector<1x8x8xf32>, vector<1x8x8xf32>, vector<1x8x8xf32>, vector<1x8x8xf32>, vector<1x8x8xf32>, vector<1x8x8xf32>, vector<1x8x8xf32> -> vector<8x8x8xf32>
    %27 = vector.extract_strided_slice %5 {offsets = [0, 32], sizes = [16, 8], strides = [1, 1]} : vector<16x96xf32> to vector<16x8xf32>
    %28 = vector.extract_strided_slice %5 {offsets = [0, 40], sizes = [16, 8], strides = [1, 1]} : vector<16x96xf32> to vector<16x8xf32>
    %29 = vector.extract_strided_slice %5 {offsets = [0, 48], sizes = [16, 8], strides = [1, 1]} : vector<16x96xf32> to vector<16x8xf32>
    %30 = vector.extract_strided_slice %5 {offsets = [0, 56], sizes = [16, 8], strides = [1, 1]} : vector<16x96xf32> to vector<16x8xf32>
    %31 = vector.extract_strided_slice %27 {offsets = [0, 0], sizes = [8, 8], strides = [1, 1]} : vector<16x8xf32> to vector<8x8xf32>
    %32 = vector.extract_strided_slice %28 {offsets = [0, 0], sizes = [8, 8], strides = [1, 1]} : vector<16x8xf32> to vector<8x8xf32>
    %33 = vector.extract_strided_slice %29 {offsets = [0, 0], sizes = [8, 8], strides = [1, 1]} : vector<16x8xf32> to vector<8x8xf32>
    %34 = vector.extract_strided_slice %30 {offsets = [0, 0], sizes = [8, 8], strides = [1, 1]} : vector<16x8xf32> to vector<8x8xf32>
    %35 = vector.extract_strided_slice %27 {offsets = [8, 0], sizes = [8, 8], strides = [1, 1]} : vector<16x8xf32> to vector<8x8xf32>
    %36 = vector.extract_strided_slice %28 {offsets = [8, 0], sizes = [8, 8], strides = [1, 1]} : vector<16x8xf32> to vector<8x8xf32>
    %37 = vector.extract_strided_slice %29 {offsets = [8, 0], sizes = [8, 8], strides = [1, 1]} : vector<16x8xf32> to vector<8x8xf32>
    %38 = vector.extract_strided_slice %30 {offsets = [8, 0], sizes = [8, 8], strides = [1, 1]} : vector<16x8xf32> to vector<8x8xf32>
    %39 = vector.shape_cast %31 : vector<8x8xf32> to vector<1x8x8xf32>
    %40 = vector.shape_cast %32 : vector<8x8xf32> to vector<1x8x8xf32>
    %41 = vector.shape_cast %33 : vector<8x8xf32> to vector<1x8x8xf32>
    %42 = vector.shape_cast %34 : vector<8x8xf32> to vector<1x8x8xf32>
    %43 = vector.shape_cast %35 : vector<8x8xf32> to vector<1x8x8xf32>
    %44 = vector.shape_cast %36 : vector<8x8xf32> to vector<1x8x8xf32>
    %45 = vector.shape_cast %37 : vector<8x8xf32> to vector<1x8x8xf32>
    %46 = vector.shape_cast %38 : vector<8x8xf32> to vector<1x8x8xf32>
    %47 = tpu.concatenate %39, %40, %41, %42, %43, %44, %45, %46 in 0 : vector<1x8x8xf32>, vector<1x8x8xf32>, vector<1x8x8xf32>, vector<1x8x8xf32>, vector<1x8x8xf32>, vector<1x8x8xf32>, vector<1x8x8xf32>, vector<1x8x8xf32> -> vector<8x8x8xf32>
    %48 = vector.extract_strided_slice %5 {offsets = [0, 64], sizes = [16, 8], strides = [1, 1]} : vector<16x96xf32> to vector<16x8xf32>
    %49 = vector.extract_strided_slice %5 {offsets = [0, 72], sizes = [16, 8], strides = [1, 1]} : vector<16x96xf32> to vector<16x8xf32>
    %50 = vector.extract_strided_slice %5 {offsets = [0, 80], sizes = [16, 8], strides = [1, 1]} : vector<16x96xf32> to vector<16x8xf32>
    %51 = vector.extract_strided_slice %5 {offsets = [0, 88], sizes = [16, 8], strides = [1, 1]} : vector<16x96xf32> to vector<16x8xf32>
    %52 = vector.extract_strided_slice %48 {offsets = [0, 0], sizes = [8, 8], strides = [1, 1]} : vector<16x8xf32> to vector<8x8xf32>
    %53 = vector.extract_strided_slice %49 {offsets = [0, 0], sizes = [8, 8], strides = [1, 1]} : vector<16x8xf32> to vector<8x8xf32>
    %54 = vector.extract_strided_slice %50 {offsets = [0, 0], sizes = [8, 8], strides = [1, 1]} : vector<16x8xf32> to vector<8x8xf32>
    %55 = vector.extract_strided_slice %51 {offsets = [0, 0], sizes = [8, 8], strides = [1, 1]} : vector<16x8xf32> to vector<8x8xf32>
    %56 = vector.extract_strided_slice %48 {offsets = [8, 0], sizes = [8, 8], strides = [1, 1]} : vector<16x8xf32> to vector<8x8xf32>
    %57 = vector.extract_strided_slice %49 {offsets = [8, 0], sizes = [8, 8], strides = [1, 1]} : vector<16x8xf32> to vector<8x8xf32>
    %58 = vector.extract_strided_slice %50 {offsets = [8, 0], sizes = [8, 8], strides = [1, 1]} : vector<16x8xf32> to vector<8x8xf32>
    %59 = vector.extract_strided_slice %51 {offsets = [8, 0], sizes = [8, 8], strides = [1, 1]} : vector<16x8xf32> to vector<8x8xf32>
    %60 = vector.shape_cast %52 : vector<8x8xf32> to vector<1x8x8xf32>
    %61 = vector.shape_cast %53 : vector<8x8xf32> to vector<1x8x8xf32>
    %62 = vector.shape_cast %54 : vector<8x8xf32> to vector<1x8x8xf32>
    %63 = vector.shape_cast %55 : vector<8x8xf32> to vector<1x8x8xf32>
    %64 = vector.shape_cast %56 : vector<8x8xf32> to vector<1x8x8xf32>
    %65 = vector.shape_cast %57 : vector<8x8xf32> to vector<1x8x8xf32>
    %66 = vector.shape_cast %58 : vector<8x8xf32> to vector<1x8x8xf32>
    %67 = vector.shape_cast %59 : vector<8x8xf32> to vector<1x8x8xf32>
    %68 = tpu.concatenate %60, %61, %62, %63, %64, %65, %66, %67 in 0 : vector<1x8x8xf32>, vector<1x8x8xf32>, vector<1x8x8xf32>, vector<1x8x8xf32>, vector<1x8x8xf32>, vector<1x8x8xf32>, vector<1x8x8xf32>, vector<1x8x8xf32> -> vector<8x8x8xf32>
    "tpu.trace_start"() <{level = 10 : i32, message = "hqd,hkd->hqk"}> : () -> ()
    %cst_5 = arith.constant dense<0.000000e+00> : vector<8x8x8xf32>
    %69 = tpu.matmul %26, %47, %cst_5 {dimension_numbers = #tpu.dot_dimension_numbers<[2], [2], [1], [1], [0, 0, 0, 1, 1, 1], [0], [0]>} : vector<8x8x8xf32>, vector<8x8x8xf32>, vector<8x8x8xf32> -> vector<8x8x8xf32>
    "tpu.trace_stop"() : () -> ()
    %cst_6 = arith.constant dense<0xFF800000> : vector<8x8xf32>
    %70 = vector.multi_reduction <maximumf>, %69, %cst_6 [2] : vector<8x8x8xf32> to vector<8x8xf32>
    %71 = vector.shape_cast %70 : vector<8x8xf32> to vector<8x8x1xf32>
    %72 = vector.broadcast %71 : vector<8x8x1xf32> to vector<8x8x8xf32>
    %73 = arith.subf %69, %72 : vector<8x8x8xf32>
    %74 = math.exp %73 : vector<8x8x8xf32>
    %cst_7 = arith.constant dense<0.000000e+00> : vector<8x8xf32>
    %75 = vector.multi_reduction <add>, %74, %cst_7 [2] : vector<8x8x8xf32> to vector<8x8xf32>
    %76 = vector.shape_cast %75 : vector<8x8xf32> to vector<8x8x1xf32>
    %77 = tpu.reciprocal %76 : vector<8x8x1xf32> -> vector<8x8x1xf32>
    %78 = vector.broadcast %77 : vector<8x8x1xf32> to vector<8x8x8xf32>
    %79 = arith.mulf %74, %78 : vector<8x8x8xf32>
    "tpu.trace_start"() <{level = 10 : i32, message = "hqk,hkd->hqd"}> : () -> ()
    %cst_8 = arith.constant dense<0.000000e+00> : vector<8x8x8xf32>
    %80 = tpu.matmul %79, %68, %cst_8 {dimension_numbers = #tpu.dot_dimension_numbers<[2], [1], [1], [2], [0, 0, 0, 1, 1, 2], [0], [0]>} : vector<8x8x8xf32>, vector<8x8x8xf32>, vector<8x8x8xf32> -> vector<8x8x8xf32>
    "tpu.trace_stop"() : () -> ()
    %81 = vector.extract_strided_slice %80 {offsets = [0, 0, 0], sizes = [1, 8, 8], strides = [1, 1, 1]} : vector<8x8x8xf32> to vector<1x8x8xf32>
    %82 = vector.shape_cast %81 : vector<1x8x8xf32> to vector<8x8xf32>
    %83 = vector.extract_strided_slice %80 {offsets = [1, 0, 0], sizes = [1, 8, 8], strides = [1, 1, 1]} : vector<8x8x8xf32> to vector<1x8x8xf32>
    %84 = vector.shape_cast %83 : vector<1x8x8xf32> to vector<8x8xf32>
    %85 = vector.extract_strided_slice %80 {offsets = [2, 0, 0], sizes = [1, 8, 8], strides = [1, 1, 1]} : vector<8x8x8xf32> to vector<1x8x8xf32>
    %86 = vector.shape_cast %85 : vector<1x8x8xf32> to vector<8x8xf32>
    %87 = vector.extract_strided_slice %80 {offsets = [3, 0, 0], sizes = [1, 8, 8], strides = [1, 1, 1]} : vector<8x8x8xf32> to vector<1x8x8xf32>
    %88 = vector.shape_cast %87 : vector<1x8x8xf32> to vector<8x8xf32>
    %89 = tpu.concatenate %82, %84, %86, %88 in 1 : vector<8x8xf32>, vector<8x8xf32>, vector<8x8xf32>, vector<8x8xf32> -> vector<8x32xf32>
    %90 = vector.extract_strided_slice %80 {offsets = [4, 0, 0], sizes = [1, 8, 8], strides = [1, 1, 1]} : vector<8x8x8xf32> to vector<1x8x8xf32>
    %91 = vector.shape_cast %90 : vector<1x8x8xf32> to vector<8x8xf32>
    %92 = vector.extract_strided_slice %80 {offsets = [5, 0, 0], sizes = [1, 8, 8], strides = [1, 1, 1]} : vector<8x8x8xf32> to vector<1x8x8xf32>
    %93 = vector.shape_cast %92 : vector<1x8x8xf32> to vector<8x8xf32>
    %94 = vector.extract_strided_slice %80 {offsets = [6, 0, 0], sizes = [1, 8, 8], strides = [1, 1, 1]} : vector<8x8x8xf32> to vector<1x8x8xf32>
    %95 = vector.shape_cast %94 : vector<1x8x8xf32> to vector<8x8xf32>
    %96 = vector.extract_strided_slice %80 {offsets = [7, 0, 0], sizes = [1, 8, 8], strides = [1, 1, 1]} : vector<8x8x8xf32> to vector<1x8x8xf32>
    %97 = vector.shape_cast %96 : vector<1x8x8xf32> to vector<8x8xf32>
    %98 = tpu.concatenate %91, %93, %95, %97 in 1 : vector<8x8xf32>, vector<8x8xf32>, vector<8x8xf32>, vector<8x8xf32> -> vector<8x32xf32>
    %99 = tpu.concatenate %89, %98 in 0 : vector<8x32xf32>, vector<8x32xf32> -> vector<16x32xf32>
    %c0_9 = arith.constant 0 : index
    %c0_10 = arith.constant 0 : index
    %100 = vector.load %arg4[%c0_9, %c0_10] : memref<16x32xf32, #tpu.memory_space<vmem>>, vector<16x32xf32>
    tpu.vector_store %arg4[%c0_9, %c0_10], %99 {strides = array<i32>} : memref<16x32xf32, #tpu.memory_space<vmem>>, vector<16x32xf32>,
    return
  }
  func.func @transform_0(%arg0: i32) -> (i32, i32) {
    %c0_i32 = arith.constant 0 : i32
    %c0_i32_0 = arith.constant 0 : i32
    %c0_i32_1 = arith.constant 0 : i32
    return %c0_i32, %c0_i32_0 : i32, i32
  }
  func.func @transform_1(%arg0: i32) -> (i32, i32) {
    %c0_i32 = arith.constant 0 : i32
    %c0_i32_0 = arith.constant 0 : i32
    %c0_i32_1 = arith.constant 0 : i32
    return %c0_i32, %c0_i32_0 : i32, i32
  }
  func.func @transform_2(%arg0: i32) -> (i32, i32) {
    %c0_i32 = arith.constant 0 : i32
    %c0_i32_0 = arith.constant 0 : i32
    %c0_i32_1 = arith.constant 0 : i32
    return %c0_i32, %c0_i32_0 : i32, i32
  }
  func.func @transform_3(%arg0: i32) -> (i32, i32) {
    %c0_i32 = arith.constant 0 : i32
    %c0_i32_0 = arith.constant 0 : i32
    %c0_i32_1 = arith.constant 0 : i32
    return %c0_i32, %c0_i32_0 : i32, i32
  }
}

</mosaic_0001>

<bundles_post_ra>
// kernel: tpu_custom_call.1
= control target key start
LH: loop header
LB: loop body
LE: loop exit
PB: predicated region body
PF: predicated region fallthrough
CT: control target
= control target key end

     0   :  { %8 = vsyncpa [#allocation3], 0  ;;  %s1994_s0 = inlined_call_operand.hbm [shape: f32[16,32], index: 0, kind: input, shape index: {}]   ;;  %s1995_s1 = inlined_call_operand.hbm [shape: f32[32,96], index: 1, kind: input, shape index: {}]   ;;  %s1996_s2 = inlined_call_operand.vmem [shape: f32[1,96], index: 2, kind: input, shape index: {}]   ;;  %s1997_s3 = inlined_call_operand.hbm [shape: f32[16,32], index: 3, kind: output, shape index: {}]  }
   0x1   :  { %9 = vsyncpa [#allocation6], 0 }
   0x2   :  { %10 = vsyncpa [#allocation4], 0  ;;  %s1777_s12 = smov [#allocation2]  }
   0x3   :  { %s16_s13 = sshll.u32 %s1777_s12, 4  ;;  %s17_s13 = int_to_ptr.vmem [resolvable:$true] %s16_s13 }
   0x4   :  { %s1719_s14 = scalar_lea.vmem %s17_s13, 256  ;;  %p1724_p1 = scmp.lt.s32.totalorder %s17_s13, %s17_s13 }
   0x5   :  { %p1720_p0 = scmp.ne.s32.totalorder %s17_s13, %s1719_s14  ;;  %p1725_p2 = scmp.lt.s32.totalorder %s1719_s14, %s1719_s14 }
   0x7   :  { %p1726_p3 = por %p1725_p2, %p1724_p1 }
   0x9   :  { %p1727_p4 = pnand %p1726_p3, %p1720_p0 }
   0xb   :  { %1730 = shalt.err (!%p1727_p4)
}
   0xc   :  { %s1778_s15 = smov 128   ;;  %s1779_s16 = smov 8  }
   0xd   :  { %22 = dma.hbm_to_vmem [thread:$0]  %s1994_s0, 256, %s17_s13, [#allocation3], %s1778_s15, %s1778_s15, %s1779_s16  }
   0xe   :  { %s1780_s19 = smov [#allocation5]  }
   0xf   :  { %s28_s20 = sshll.u32 %s1780_s19, 4  ;;  %s29_s20 = int_to_ptr.vmem [resolvable:$true] %s28_s20 }
  0x10   :  { %s1739_s21 = scalar_lea.vmem %s29_s20, 512  ;;  %p1744_p6 = scmp.lt.s32.totalorder %s29_s20, %s29_s20 }
  0x11   :  { %p1740_p5 = scmp.ne.s32.totalorder %s29_s20, %s1739_s21  ;;  %p1745_p7 = scmp.lt.s32.totalorder %s1739_s21, %s1739_s21 }
  0x13   :  { %p1746_p8 = por %p1745_p7, %p1744_p6 }
  0x15   :  { %p1747_p9 = pnand %p1746_p8, %p1740_p5 }
  0x17   :  { %1750 = shalt.err (!%p1747_p9)
}
  0x18   :  { %34 = dma.hbm_to_vmem [thread:$0]  %s1995_s1, 512, %s29_s20, [#allocation6], %s1778_s15, %s1778_s15, %s1779_s16  }
  0x19   :  { %1771 = dma.done.wait [#allocation3], 256  }
  0x1a   :  { %1772 = vsyncadd [#allocation3], 4294967040 }
  0x1b   :  { %1773 = dma.done.wait [#allocation6], 512  }
  0x1c   :  { %1774 = vsyncadd [#allocation6], 4294966784  ;;  %vm56_vm0 = vcmask 261120   ;;  %v48_v0 = vld [vmem:[#allocation5 + $0x18] sm:$0xff]  ;;  %v47_v1 = vld [vmem:[#allocation5 + $0x10] sm:$0xff]  ;;  %v1781_v7 = vmov 0.0  }
  0x1d   :  { %1574 = vmatprep.subr.mxu0 %v48_v0  ;;  %v43_v2 = vld [vmem:[#allocation2] sm:$0xff]  ;;  %v46_v3 = vld [vmem:[#allocation5 + $0x8] sm:$0xff]  ;;  %v45_v4 = vld [vmem:[#allocation5] sm:$0xff]  ;;  %1585 = vmatprep.subr.mxu1 %v1781_v7  ;;  %s1782_s24 = smov 104   ;;  %s1783_s25 = smov 120   ;;  %vm1784_vm1 = vmmov 0  }
  0x1e   :  { %1575 = vmatpush3.msra.mxu0 %v48_v0  ;;  %1582 = vmatprep.mubr.msk.f32.mxu0 %vm56_vm0, %v43_v2  ;;  %v44_v5 = vld [vmem:[#allocation2 + $0x8] sm:$0xff]  ;;  %v1509_v8 = vld [vmem:[%s1996_s2] ss:$0 sm:$0xff]  ;;  %s1785_s2 = smov 112   ;;  %s1786_s26 = smov 96   ;;  %vm154_vm2 = vcmask 64512  }
  0x1f   :  { %1576 = vmatprep.subr.mxu0 %v47_v1  ;;  %1587 = vmatprep.mubr.msk.f32.mxu1 %vm1784_vm1, %v1781_v7  ;;  %s1787_s27 = smov 64   ;;  %s1788_s28 = smov 16   ;;  %vm1470_vm3 = vcmask 130048   ;;  %vm1472_vm4 = vcmask 195584  }
  0x20   :  { %1577 = vmatpush3.msra.mxu0 %v47_v1  ;;  %s1789_s29 = smov 24   ;;  %s1790_s30 = smov [#allocation7]  }
  0x21   :  { %1578 = vmatprep.subr.mxu0 %v46_v3  ;;  %s1496_s4 = sshll.u32 %s1790_s30, 4  ;;  %s1497_s4 = int_to_ptr.vmem [resolvable:$true] %s1496_s4 }
  0x22   :  { %1579 = vmatpush3.msra.mxu0 %v46_v3  ;;  %s1751_s5 = scalar_lea.vmem %s1497_s4, 256  ;;  %p1756_p11 = scmp.lt.s32.totalorder %s1497_s4, %s1497_s4 }
  0x23   :  { %1580 = vmatprep.subr.mxu0 %v45_v4  ;;  %p1752_p10 = scmp.ne.s32.totalorder %s1497_s4, %s1751_s5  ;;  %p1757_p12 = scmp.lt.s32.totalorder %s1751_s5, %s1751_s5 }
  0x24   :  { %1581 = vmatpush3.msra.mxu0 %v45_v4 }
  0x25   :  { %1583 = vmatmul.mubr.msk.f32.vlgmr.msra.gmra.mxu0 %vm56_vm0, %v44_v5  ;;  %1595 = vmatprep.subr.mxu0 %v1781_v7  ;;  %p1758_p13 = por %p1757_p12, %p1756_p11 }
  0x26   :  { %1597 = vmatprep.mubr.msk.f32.mxu0 %vm1784_vm1, %v1781_v7 }
  0x27   :  { %p1759_p0 = pnand %p1758_p13, %p1752_p10 }
  0xe5   :  { %v1584_v6 = vpop.f32.mrf.mxu0 }
  0xe6   :  { %v1838_v11 = vadd.f32 %v1584_v6, %v1509_v8 }
  0xe7   :  { %v129_v9 = vpop.f32.mrf.mxu0 }
  0xe8   :  { %v1830_v10 = vadd.f32 %v1509_v8, %v129_v9 }
  0xea   :  { %143 = vrot.lane.b32.xlu1 %v1830_v10, %s1782_s24  ;;  %139 = vrot.lane.b32.xlu0 %v1830_v10, %s1783_s25 }
  0xee   :  { %146 = vrot.lane.b32.xlu1 %v1838_v11, %s1783_s25  ;;  %141 = vrot.lane.b32.xlu0 %v1830_v10, %s1785_s2 }
  0xf2   :  { %150 = vrot.lane.b32.xlu1 %v1838_v11, %s1782_s24  ;;  %148 = vrot.lane.b32.xlu0 %v1838_v11, %s1785_s2 }
  0xf6   :  { %152 = vrot.lane.b32.xlu0 %v1830_v10, %s1786_s26 }
 0x15c   :  { %v1845_v12 = vpop.permute.xlu1 %143  ;;  %v1847_v13 = vpop.permute.xlu0 %139 }
 0x15d   :  { %229 = vrot.lane.b32.xlu1 %v1847_v13, %s1786_s26 }
 0x160   :  { %v1850_v14 = vpop.permute.xlu0 %141  ;;  %v1854_v15 = vpop.permute.xlu1 %146 }
 0x161   :  { %381 = vrot.lane.b32.xlu1 %v1845_v12, %s1786_s26  ;;  %305 = vrot.lane.b32.xlu0 %v1850_v14, %s1786_s26 }
 0x164   :  { %v1856_v16 = vpop.permute.xlu0 %148  ;;  %v1860_v17 = vpop.permute.xlu1 %150 }
 0x165   :  { %533 = vrot.lane.b32.xlu1 %v1854_v15, %s1786_s26  ;;  %457 = vrot.lane.b32.xlu0 %v1838_v11, %s1786_s26 }
 0x168   :  { %v153_v18 = vpop.permute.xlu0 %152 }
 0x169   :  { %685 = vrot.lane.b32.xlu1 %v1860_v17, %s1786_s26  ;;  %609 = vrot.lane.b32.xlu0 %v1856_v16, %s1786_s26 }
 0x16a   :  { %1586 = vmatpush3.xpose.msk.msra.mxu1 %vm154_vm2, %v153_v18 }
 0x16b   :  { %1590 = vmatprep.subr.mxu1 %v1781_v7 }
 0x16d   :  { %1588 = vmatmul.mubr.msk.f32.vlgmr.msra.gmra.mxu1 %vm154_vm2, %v1830_v10 }
 0x16e   :  { %1592 = vmatprep.mubr.msk.f32.mxu1 %vm1784_vm1, %v1781_v7 }
 0x1cf   :  { %v230_v19 = vpop.permute.xlu1 %229 }
 0x1d0   :  { %1591 = vmatpush3.xpose.msk.msra.mxu1 %vm154_vm2, %v230_v19 }
 0x1d1   :  { %1600 = vmatprep.subr.mxu1 %v1781_v7 }
 0x1d3   :  { %v382_v20 = vpop.permute.xlu1 %381  ;;  %1593 = vmatmul.mubr.msk.f32.vlgmr.msra.gmra.mxu1 %vm154_vm2, %v1847_v13  ;;  %v306_v21 = vpop.permute.xlu0 %305 }
 0x1d4   :  { %1596 = vmatpush3.xpose.msk.msra.mxu0 %vm154_vm2, %v306_v21  ;;  %1601 = vmatpush3.xpose.msk.msra.mxu1 %vm154_vm2, %v382_v20 }
 0x1d5   :  { %1602 = vmatprep.mubr.msk.f32.mxu1 %vm1784_vm1, %v1781_v7  ;;  %1605 = vmatprep.subr.mxu0 %v1781_v7 }
 0x1d6   :  { %1610 = vmatprep.subr.mxu1 %v1781_v7 }
 0x1d7   :  { %v534_v22 = vpop.permute.xlu1 %533  ;;  %1598 = vmatmul.mubr.msk.f32.vlgmr.msra.gmra.mxu0 %vm154_vm2, %v1850_v14  ;;  %1603 = vmatmul.mubr.msk.f32.vlgmr.msra.gmra.mxu1 %vm154_vm2, %v1845_v12  ;;  %v458_v23 = vpop.permute.xlu0 %457 }
 0x1d8   :  { %1606 = vmatpush3.xpose.msk.msra.mxu0 %vm154_vm2, %v458_v23  ;;  %1611 = vmatpush3.xpose.msk.msra.mxu1 %vm154_vm2, %v534_v22 }
 0x1d9   :  { %1607 = vmatprep.mubr.msk.f32.mxu0 %vm1784_vm1, %v1781_v7  ;;  %1612 = vmatprep.mubr.msk.f32.mxu1 %vm1784_vm1, %v1781_v7 }
 0x1da   :  { %1615 = vmatprep.subr.mxu0 %v1781_v7  ;;  %1620 = vmatprep.subr.mxu1 %v1781_v7 }
 0x1db   :  { %v686_v24 = vpop.permute.xlu1 %685  ;;  %1608 = vmatmul.mubr.msk.f32.vlgmr.msra.gmra.mxu0 %vm154_vm2, %v1838_v11  ;;  %1613 = vmatmul.mubr.msk.f32.vlgmr.msra.gmra.mxu1 %vm154_vm2, %v1854_v15  ;;  %v610_v25 = vpop.permute.xlu0 %609 }
 0x1dc   :  { %1616 = vmatpush3.xpose.msk.msra.mxu0 %vm154_vm2, %v610_v25  ;;  %1621 = vmatpush3.xpose.msk.msra.mxu1 %vm154_vm2, %v686_v24 }
 0x1dd   :  { %1617 = vmatprep.mubr.msk.f32.mxu0 %vm1784_vm1, %v1781_v7  ;;  %1622 = vmatprep.mubr.msk.f32.mxu1 %vm1784_vm1, %v1781_v7 }
 0x1de   :  { %1625 = vmatprep.subr.mxu0 %v1781_v7  ;;  %1630 = vmatprep.subr.mxu1 %v1781_v7 }
 0x1df   :  { %1618 = vmatmul.mubr.msk.f32.vlgmr.msra.gmra.mxu0 %vm154_vm2, %v1856_v16  ;;  %1623 = vmatmul.mubr.msk.f32.vlgmr.msra.gmra.mxu1 %vm154_vm2, %v1860_v17 }
 0x1e0   :  { %1627 = vmatprep.mubr.msk.f32.mxu0 %vm1784_vm1, %v1781_v7  ;;  %1632 = vmatprep.mubr.msk.f32.mxu1 %vm1784_vm1, %v1781_v7 }
 0x22d   :  { %v225_v26 = vpop.f32.mrf.mxu1 }
 0x22e   :  { %v761_v27 = vsel %vm154_vm2, %v225_v26, -inf }
 0x22f   :  { %762 = vmax.xlane.f32.xlu0 %v761_v27  ;;  %v1589_v28 = vpop.f32.mrf.mxu1 }
 0x293   :  { %v301_v29 = vpop.f32.mrf.mxu1 }
 0x294   :  { %v764_v30 = vsel %vm154_vm2, %v301_v29, -inf }
 0x295   :  { %765 = vmax.xlane.f32.xlu1 %v764_v30  ;;  %v1594_v31 = vpop.f32.mrf.mxu1 }
 0x297   :  { %v377_v32 = vpop.f32.mrf.mxu0  ;;  %v453_v33 = vpop.f32.mrf.mxu1 }
 0x298   :  { %v767_v34 = vsel %vm154_vm2, %v377_v32, -inf  ;;  %v770_v39 = vsel %vm154_vm2, %v453_v33, -inf }
 0x299   :  { %v1604_v35 = vpop.f32.mrf.mxu1  ;;  %768 = vmax.xlane.f32.xlu0 %v767_v34  ;;  %v1599_v36 = vpop.f32.mrf.mxu0 }
 0x29b   :  { %v529_v37 = vpop.f32.mrf.mxu0  ;;  %v605_v38 = vpop.f32.mrf.mxu1 }
 0x29c   :  { %v773_v40 = vsel %vm154_vm2, %v529_v37, -inf  ;;  %v776_v45 = vsel %vm154_vm2, %v605_v38, -inf }
 0x29d   :  { %v1614_v41 = vpop.f32.mrf.mxu1  ;;  %771 = vmax.xlane.f32.xlu0 %v770_v39  ;;  %774 = vmax.xlane.f32.xlu1 %v773_v40  ;;  %v1609_v42 = vpop.f32.mrf.mxu0 }
 0x29f   :  { %v681_v43 = vpop.f32.mrf.mxu0  ;;  %v757_v44 = vpop.f32.mrf.mxu1 }
 0x2a0   :  { %v779_v46 = vsel %vm154_vm2, %v681_v43, -inf  ;;  %v782_v49 = vsel %vm154_vm2, %v757_v44, -inf }
 0x2a1   :  { %v1624_v47 = vpop.f32.mrf.mxu1  ;;  %777 = vmax.xlane.f32.xlu0 %v776_v45  ;;  %780 = vmax.xlane.f32.xlu1 %v779_v46  ;;  %v1619_v48 = vpop.f32.mrf.mxu0 }
 0x2a5   :  { %783 = vmax.xlane.f32.xlu0 %v782_v49 }
 0x2b2   :  { %849 = vrot.lane.b32.xlu1 %v1830_v10, %s1787_s27 }
 0x2b6   :  { %1001 = vrot.lane.b32.xlu1 %v1850_v14, %s1787_s27 }
 0x2b8   :  { %v763_v50 = vpop.xlane.xlu0 %762 }
 0x2b9   :  { %v785_v51 = vsub.f32 %v225_v26, %v763_v50 }
 0x2ba   :  { %1077 = vrot.lane.b32.xlu1 %v1845_v12, %s1787_s27 }
 0x2bb   :  { %925 = vrot.lane.b32.xlu0 %v1847_v13, %s1787_s27  ;;  %v793_v52 = vmul.f32 1.442695, %v785_v51 }
 0x2bd   :  { %1679 = vpow2.f32 %v793_v52 }
 0x2be   :  { %1229 = vrot.lane.b32.xlu1 %v1854_v15, %s1787_s27 }
 0x2bf   :  { %1153 = vrot.lane.b32.xlu0 %v1838_v11, %s1787_s27 }
 0x2ca   :  { %v1932_v53 = vpop.eup %1679 }
 0x2cb   :  { %v809_v54 = vsel %vm154_vm2, %v1932_v53, 0.0 }
 0x2e2   :  { %810 = vadd.xlane.f32.xlu1 %v809_v54 }
 0x31e   :  { %v766_v55 = vpop.xlane.xlu1 %765 }
 0x31f   :  { %v786_v56 = vsub.f32 %v301_v29, %v766_v55 }
 0x321   :  { %v795_v57 = vmul.f32 1.442695, %v786_v56 }
 0x322   :  { %v769_v58 = vpop.xlane.xlu0 %768 }
 0x323   :  { %1681 = vpow2.f32 %v795_v57  ;;  %v787_v59 = vsub.f32 %v377_v32, %v769_v58 }
 0x325   :  { %v797_v60 = vmul.f32 1.442695, %v787_v59 }
 0x326   :  { %v775_v61 = vpop.xlane.xlu1 %774  ;;  %v772_v62 = vpop.xlane.xlu0 %771 }
 0x327   :  { %1683 = vpow2.f32 %v797_v60  ;;  %v789_v63 = vsub.f32 %v529_v37, %v775_v61  ;;  %v788_v0 = vsub.f32 %v453_v33, %v772_v62 }
 0x329   :  { %v801_v1 = vmul.f32 1.442695, %v789_v63  ;;  %v799_v2 = vmul.f32 1.442695, %v788_v0 }
 0x32a   :  { %v781_v3 = vpop.xlane.xlu1 %780  ;;  %v778_v4 = vpop.xlane.xlu0 %777 }
 0x32b   :  { %1685 = vpow2.f32 %v801_v1  ;;  %v791_v5 = vsub.f32 %v681_v43, %v781_v3  ;;  %v790_v6 = vsub.f32 %v605_v38, %v778_v4 }
 0x32c   :  { %1687 = vpow2.f32 %v799_v2 }
 0x32d   :  { %v805_v8 = vmul.f32 1.442695, %v791_v5  ;;  %v803_v9 = vmul.f32 1.442695, %v790_v6 }
 0x32e   :  { %v850_v10 = vpop.permute.xlu1 %849  ;;  %v784_v11 = vpop.xlane.xlu0 %783 }
 0x32f   :  { %1689 = vpow2.f32 %v805_v8  ;;  %v792_v12 = vsub.f32 %v757_v44, %v784_v11  ;;  %1626 = vmatpush3.msra.mxu0 %v850_v10 }
 0x330   :  { %v1682_v13 = vpop.eup %1681  ;;  %1691 = vpow2.f32 %v803_v9  ;;  %1635 = vmatprep.subr.mxu0 %v1781_v7 }
 0x331   :  { %v807_v14 = vmul.f32 1.442695, %v792_v12  ;;  %v812_v15 = vsel %vm154_vm2, %v1682_v13, 0.0 }
 0x332   :  { %813 = vadd.xlane.f32.xlu0 %v812_v15  ;;  %v926_v18 = vpop.permute.xlu0 %925  ;;  %v1002_v31 = vpop.permute.xlu1 %1001 }
 0x333   :  { %1693 = vpow2.f32 %v807_v14  ;;  %1631 = vmatpush3.msra.mxu1 %v926_v18 }
 0x334   :  { %v1684_v19 = vpop.eup %1683  ;;  %1640 = vmatprep.subr.mxu1 %v1781_v7 }
 0x335   :  { %v815_v20 = vsel %vm154_vm2, %v1684_v19, 0.0 }
 0x336   :  { %816 = vadd.xlane.f32.xlu1 %v815_v20  ;;  %v1078_v32 = vpop.permute.xlu1 %1077 }
 0x338   :  { %v1686_v21 = vpop.eup %1685 }
 0x339   :  { %v1688_v22 = vpop.eup %1687  ;;  %v821_v23 = vsel %vm154_vm2, %v1686_v21, 0.0 }
 0x33a   :  { %822 = vadd.xlane.f32.xlu1 %v821_v23  ;;  %v818_v24 = vsel %vm154_vm2, %v1688_v22, 0.0  ;;  %v1230_v33 = vpop.permute.xlu1 %1229 }
 0x33b   :  { %819 = vadd.xlane.f32.xlu0 %v818_v24 }
 0x33c   :  { %v1690_v25 = vpop.eup %1689 }
 0x33d   :  { %v1942_v26 = vpop.eup %1691  ;;  %v827_v27 = vsel %vm154_vm2, %v1690_v25, 0.0 }
 0x33e   :  { %828 = vadd.xlane.f32.xlu1 %v827_v27  ;;  %v824_v28 = vsel %vm154_vm2, %v1942_v26, 0.0 }
 0x33f   :  { %825 = vadd.xlane.f32.xlu0 %v824_v28 }
 0x340   :  { %v1947_v29 = vpop.eup %1693 }
 0x341   :  { %v830_v30 = vsel %vm154_vm2, %v1947_v29, 0.0 }
 0x343   :  { %831 = vadd.xlane.f32.xlu0 %v830_v30 }
 0x34f   :  { %1381 = vrot.lane.b32.xlu1 %v1860_v17, %s1787_s27  ;;  %v1154_v17 = vpop.permute.xlu0 %1153 }
 0x359   :  { %1305 = vrot.lane.b32.xlu0 %v1856_v16, %s1787_s27 }
 0x36b   :  { %v811_v34 = vpop.xlane.xlu1 %810 }
 0x36c   :  { %1695 = vrcp.f32 %v811_v34 }
 0x379   :  { %v1696_v35 = vpop.eup %1695 }
 0x37a   :  { %v841_v36 = vmul.f32 %v1696_v35, %v1932_v53 }
 0x37c   :  { %1628 = vmatmul.mubr.msk.f32.vlgmr.msra.gmra.mxu0 %vm154_vm2, %v841_v36 }
 0x37d   :  { %1636 = vmatpush3.msra.mxu0 %v1002_v31  ;;  %1637 = vmatprep.mubr.msk.f32.mxu0 %vm1784_vm1, %v1781_v7 }
 0x37e   :  { %1645 = vmatprep.subr.mxu0 %v1781_v7 }
 0x3bb   :  { %v814_v37 = vpop.xlane.xlu0 %813 }
 0x3bc   :  { %1697 = vrcp.f32 %v814_v37 }
 0x3bf   :  { %v817_v16 = vpop.xlane.xlu1 %816 }
 0x3c0   :  { %1699 = vrcp.f32 %v817_v16 }
 0x3c3   :  { %v823_v38 = vpop.xlane.xlu1 %822 }
 0x3c4   :  { %1701 = vrcp.f32 %v823_v38  ;;  %v820_v39 = vpop.xlane.xlu0 %819 }
 0x3c5   :  { %1703 = vrcp.f32 %v820_v39 }
 0x3c7   :  { %v829_v40 = vpop.xlane.xlu1 %828 }
 0x3c8   :  { %1705 = vrcp.f32 %v829_v40  ;;  %v826_v41 = vpop.xlane.xlu0 %825 }
 0x3c9   :  { %v1698_v42 = vpop.eup %1697  ;;  %1707 = vrcp.f32 %v826_v41 }
 0x3ca   :  { %v842_v43 = vmul.f32 %v1698_v42, %v1682_v13 }
 0x3cb   :  { %v1382_v56 = vpop.permute.xlu1 %1381 }
 0x3cc   :  { %v832_v44 = vpop.xlane.xlu0 %831  ;;  %1633 = vmatmul.mubr.msk.f32.vlgmr.msra.gmra.mxu1 %vm154_vm2, %v842_v43 }
 0x3cd   :  { %v1700_v45 = vpop.eup %1699  ;;  %1709 = vrcp.f32 %v832_v44  ;;  %1641 = vmatpush3.msra.mxu1 %v1078_v32  ;;  %1642 = vmatprep.mubr.msk.f32.mxu1 %vm1784_vm1, %v1781_v7 }
 0x3ce   :  { %v843_v46 = vmul.f32 %v1700_v45, %v1684_v19  ;;  %1650 = vmatprep.subr.mxu1 %v1781_v7 }
 0x3d0   :  { %1638 = vmatmul.mubr.msk.f32.vlgmr.msra.gmra.mxu0 %vm154_vm2, %v843_v46  ;;  %v1306_v51 = vpop.permute.xlu0 %1305 }
 0x3d1   :  { %v1702_v47 = vpop.eup %1701  ;;  %1646 = vmatpush3.msra.mxu0 %v1154_v17  ;;  %1647 = vmatprep.mubr.msk.f32.mxu0 %vm1784_vm1, %v1781_v7 }
 0x3d2   :  { %v1704_v48 = vpop.eup %1703  ;;  %1655 = vmatprep.subr.mxu0 %v1781_v7  ;;  %v845_v49 = vmul.f32 %v1702_v47, %v1686_v21 }
 0x3d3   :  { %v844_v50 = vmul.f32 %v1704_v48, %v1688_v22 }
 0x3d4   :  { %1648 = vmatmul.mubr.msk.f32.vlgmr.msra.gmra.mxu0 %vm154_vm2, %v845_v49 }
 0x3d5   :  { %v1706_v52 = vpop.eup %1705  ;;  %1643 = vmatmul.mubr.msk.f32.vlgmr.msra.gmra.mxu1 %vm154_vm2, %v844_v50  ;;  %1656 = vmatpush3.msra.mxu0 %v1306_v51 }
 0x3d6   :  { %v1708_v53 = vpop.eup %1707  ;;  %1651 = vmatpush3.msra.mxu1 %v1230_v33  ;;  %1652 = vmatprep.mubr.msk.f32.mxu1 %vm1784_vm1, %v1781_v7  ;;  %v847_v54 = vmul.f32 %v1706_v52, %v1690_v25 }
 0x3d7   :  { %1657 = vmatprep.mubr.msk.f32.mxu0 %vm1784_vm1, %v1781_v7  ;;  %1660 = vmatprep.subr.mxu1 %v1781_v7  ;;  %v846_v55 = vmul.f32 %v1708_v53, %v1942_v26 }
 0x3d8   :  { %1658 = vmatmul.mubr.msk.f32.vlgmr.msra.gmra.mxu0 %vm154_vm2, %v847_v54 }
 0x3d9   :  { %1653 = vmatmul.mubr.msk.f32.vlgmr.msra.gmra.mxu1 %vm154_vm2, %v846_v55 }
 0x3da   :  { %v1710_v57 = vpop.eup %1709  ;;  %1661 = vmatpush3.msra.mxu1 %v1382_v56  ;;  %1662 = vmatprep.mubr.msk.f32.mxu1 %vm1784_vm1, %v1781_v7 }
 0x3db   :  { %v848_v58 = vmul.f32 %v1710_v57, %v1947_v29 }
 0x3dd   :  { %1663 = vmatmul.mubr.msk.f32.vlgmr.msra.gmra.mxu1 %vm154_vm2, %v848_v58 }
 0x43c   :  { %v921_v59 = vpop.f32.mrf.mxu0 }
 0x43e   :  { %v1629_v60 = vpop.f32.mrf.mxu0 }
 0x48c   :  { %v997_v61 = vpop.f32.mrf.mxu1 }
 0x48d   :  { %1458 = vrot.lane.b32.xlu0 %v997_v61, %s1779_s16 }
 0x48e   :  { %v1634_v62 = vpop.f32.mrf.mxu1 }
 0x490   :  { %v1073_v63 = vpop.f32.mrf.mxu0 }
 0x491   :  { %1462 = vrot.lane.b32.xlu0 %v1073_v63, %s1788_s28 }
 0x492   :  { %v1639_v0 = vpop.f32.mrf.mxu0 }
 0x494   :  { %v1225_v1 = vpop.f32.mrf.mxu0 }
 0x495   :  { %v1149_v2 = vpop.f32.mrf.mxu1 }
 0x496   :  { %1466 = vrot.lane.b32.xlu0 %v1149_v2, %s1789_s29  ;;  %v1649_v3 = vpop.f32.mrf.mxu0 }
 0x497   :  { %v1644_v7 = vpop.f32.mrf.mxu1 }
 0x498   :  { %v1377_v4 = vpop.f32.mrf.mxu0 }
 0x499   :  { %v1301_v5 = vpop.f32.mrf.mxu1 }
 0x49a   :  { %1475 = vrot.lane.b32.xlu1 %v1301_v5, %s1779_s16  ;;  %v1659_v6 = vpop.f32.mrf.mxu0 }
 0x49b   :  { %v1654_v8 = vpop.f32.mrf.mxu1 }
 0x49d   :  { %v1453_v9 = vpop.f32.mrf.mxu1 }
 0x49e   :  { %1479 = vrot.lane.b32.xlu1 %v1377_v4, %s1788_s28 }
 0x49f   :  { %v1664_v10 = vpop.f32.mrf.mxu1 }
 0x4a2   :  { %1483 = vrot.lane.b32.xlu1 %v1453_v9, %s1789_s29 }
 0x4ff   :  { %v1459_v11 = vpop.permute.xlu0 %1458 }
 0x500   :  { %v1469_v13 = vsel %vm154_vm2, %v921_v59, %v1459_v11 }
 0x503   :  { %v1463_v12 = vpop.permute.xlu0 %1462 }
 0x504   :  { %v1471_v14 = vsel %vm1470_vm3, %v1469_v13, %v1463_v12 }
 0x508   :  { %v1467_v15 = vpop.permute.xlu0 %1466 }
 0x509   :  { %v1473_v18 = vsel %vm1472_vm4, %v1471_v14, %v1467_v15 }
 0x50a   :  { %1489 = vst.msk [vmem:[#allocation7] sm:$0xff] %vm56_vm0, %v1473_v18 }
 0x50c   :  { %v1476_v19 = vpop.permute.xlu1 %1475 }
 0x50d   :  { %v1486_v21 = vsel %vm154_vm2, %v1225_v1, %v1476_v19 }
 0x510   :  { %v1480_v20 = vpop.permute.xlu1 %1479 }
 0x511   :  { %v1487_v22 = vsel %vm1470_vm3, %v1486_v21, %v1480_v20 }
 0x514   :  { %v1484_v23 = vpop.permute.xlu1 %1483 }
 0x515   :  { %v1488_v24 = vsel %vm1472_vm4, %v1487_v22, %v1484_v23 }
 0x516   :  { %1490 = vst.msk [vmem:[#allocation7 + $0x8] sm:$0xff] %vm56_vm0, %v1488_v24 }
 0x517   :  { %1762 = shalt.err (!%p1759_p0)
}
 0x518   :  { %1502 = dma.vmem_to_hbm [thread:$0]  %s1497_s4, 256, %s1997_s3, [#allocation4], %s1778_s15, %s1778_s15, %s1779_s16  }
 0x519   :  { %1775 = dma.done.wait [#allocation4], 256  }
 0x51a   :  { %1776 = vsyncadd [#allocation4], 4294967040 }
 0x51b   :  { %1506 = vsyncpa [#allocation3], 1 }
 0x51c   :  { %1507 = vsyncpa [#allocation6], 1 }
 0x51d   :  { %1508 = vsyncpa [#allocation4], 1 }

</bundles_post_ra>
